<compile_context>
chip_gen: v7x
topology: tpu7x:2x2x1
jax: 0.10.0
libtpu: 0.0.40
codegen_flags: <defaults>
</compile_context>

<pallas_src>
import functools

import jax
import jax.numpy as jnp
from jax import lax
from jax.experimental import pallas as pl
from jax.experimental.pallas import tpu as pltpu

WINDOW = 10          # matches `window = 10` in the reference module
_NEG_BIG = -1e30     # finite "minus infinity" for masked logits


def _skipgram_lse_kernel(vc_ref, u_ref, lse_ref, m_sc, l_sc, *,
                         tile_v, blocks_per_split, vocab, need_mask):
    """One grid step consumes one (tile_v, n) slab of the output table.

    Grid = (num_splits, blocks_per_split):
      axis 0: "parallel"  -> vocab range split across TensorCores (v7x 2-TC)
      axis 1: "arbitrary" -> online-logsumexp reduction over this split's tiles

    VMEM scratch carried across axis 1 (re-init at v == 0 for each split):
      m_sc : (B, 1) running max of logits
      l_sc : (B, 1) running sum of exp(logit - m)
    """
    v = pl.program_id(1)
    nv = pl.num_programs(1)

    @pl.when(v == 0)
    def _init():
        m_sc[...] = jnp.full_like(m_sc, -jnp.inf)
        l_sc[...] = jnp.zeros_like(l_sc)

    # Logits for this vocab tile: (B, n) @ (TV, n)^T -> (B, TV).
    # trans_b is done by the MXU feed; table is streamed in its native layout
    # and dtype (bf16 table halves the dominant HBM read, f32 accumulation).
    s = lax.dot_general(vc_ref[...], u_ref[...],
                        dimension_numbers=(((1,), (1,)), ((), ())),
                        preferred_element_type=jnp.float32)        # (B, TV)

    if need_mask:
        # Mask columns beyond the real vocab: covers the partial trailing tile
        # AND the clamped/duplicated padding tile of the last split.  (VPU
        # filler under a mem-bound loop; cheap enough to apply every step.)
        gb = pl.program_id(0) * blocks_per_split + v               # global tile
        col = gb * tile_v + lax.broadcasted_iota(jnp.int32, s.shape, 1)
        s = jnp.where(col < vocab, s, _NEG_BIG)

    m_prev = m_sc[...]
    m_new = jnp.maximum(m_prev, jnp.max(s, axis=1, keepdims=True))  # (B, 1)
    alpha = jnp.exp(m_prev - m_new)
    l_sc[...] = alpha * l_sc[...] + jnp.sum(jnp.exp(s - m_new), axis=1,
                                            keepdims=True)
    m_sc[...] = m_new

    @pl.when(v == nv - 1)
    def _finalize():
        lse = m_sc[...] + jnp.log(l_sc[...])                        # (B, 1)
        # Lane-broadcast so the write-back is an unmasked, lane-dense store.
        lse_ref[...] = jnp.broadcast_to(lse[None], lse_ref.shape)   # (1,B,128)


def skipgram_loss(x, contexts, V_weight, U_weight, *,
                  tile_vocab=4096, num_splits=None):
    """SkipGramModel forward: per-example loss of shape (B,).

    x        : (B,)   int32 center-word ids
    contexts : (B, C) int32 context-word ids
    V_weight : (Vocab, n) input-embedding table  (nn.Embedding V)
    U_weight : (Vocab, n) output-embedding table (nn.Embedding U)
               May be passed persistently pre-cast to bf16: the kernel streams
               it as-is (no per-call transpose/cast materialization).
    """
    B = x.shape[0]
    Vocab, n = U_weight.shape
    table_dtype = U_weight.dtype
    itemsize = jnp.dtype(table_dtype).itemsize

    # --- XLA glue: embedding gathers + tiny context term (negligible cost) ---
    vc_f32 = jnp.take(V_weight, x, axis=0).astype(jnp.float32)                # (B, n)
    u_context = jnp.take(U_weight, contexts, axis=0).astype(jnp.float32)      # (B, C, n)
    uv = jnp.einsum('bcn,bn->bc', u_context, vc_f32).sum(axis=1)              # (B,)

    # Hoisted cast: vc matches the streamed table dtype (one cast, not per tile).
    vc = vc_f32.astype(table_dtype)                                           # (B, n)

    # --- vocab tiling / split selection ---
    if Vocab <= tile_vocab:
        tv = Vocab                      # single full-extent tile (always legal)
    else:
        assert tile_vocab % 128 == 0, "vocab tile must be lane-aligned (x128)"
        tv = tile_vocab
    num_v = pl.cdiv(Vocab, tv)

    if num_splits is None:
        num_splits = 2 if num_v >= 2 else 1       # 2-TC split on v7x; harmless elsewhere
    num_splits = max(1, min(num_splits, num_v))
    bps = pl.cdiv(num_v, num_splits)              # vocab tiles per split
    padded_blocks = (num_splits * bps != num_v)   # last split has a duplicate tile
    need_mask = (num_splits * bps * tv) != Vocab
    last_block = num_v - 1

    if padded_blocks:
        # Clamp so the DMA never walks off the table; the duplicate tile's
        # columns are all >= Vocab and get fully masked in-kernel.
        table_index_map = lambda c, v: (jnp.minimum(c * bps + v, last_block), 0)
    else:
        table_index_map = lambda c, v: (c * bps + v, 0)

    kernel = functools.partial(_skipgram_lse_kernel, tile_v=tv,
                               blocks_per_split=bps, vocab=Vocab,
                               need_mask=need_mask)

    cost = pl.CostEstimate(
        flops=2 * B * Vocab * n,
        transcendentals=B * (num_splits * bps * tv + num_splits * bps),
        bytes_accessed=(Vocab * n * itemsize          # streamed table (dominant)
                        + B * n * itemsize            # vc (resident)
                        + num_splits * B * 128 * 4),  # partial LSE slab
    )

    # Only raise the scoped-VMEM limit when the double-buffered tile actually
    # needs it (covers v5e's 16 MiB default; 32 MiB is safe on all generations).
    vmem_needed = (2 * tv * n * itemsize + 2 * B * n * itemsize
                   + 2 * B * 128 * 4 + 2 * B * 4 + (1 << 20))
    compiler_kwargs = dict(dimension_semantics=("parallel", "arbitrary"))
    if vmem_needed > (12 << 20):
        compiler_kwargs["vmem_limit_bytes"] = min(int(vmem_needed * 1.25), 32 << 20)

    part_lse = pl.pallas_call(
        kernel,
        out_shape=jax.ShapeDtypeStruct((num_splits, B, 128), jnp.float32),
        grid_spec=pltpu.PrefetchScalarGridSpec(
            num_scalar_prefetch=0,
            grid=(num_splits, bps),
            in_specs=[
                pl.BlockSpec((B, n), lambda c, v: (0, 0)),     # vc (resident)
                pl.BlockSpec((tv, n), table_index_map),        # streamed table tile
            ],
            out_specs=pl.BlockSpec((1, B, 128), lambda c, v: (c, 0, 0)),
            scratch_shapes=[
                pltpu.VMEM((B, 1), jnp.float32),   # running max  m
                pltpu.VMEM((B, 1), jnp.float32),   # running sum  l
            ],
        ),
        compiler_params=pltpu.CompilerParams(**compiler_kwargs),
        cost_estimate=cost,
    )(vc, U_weight)

    # Combine per-split partial logsumexps (1 or 2 values per example).
    lse = jax.scipy.special.logsumexp(part_lse[:, :, 0], axis=0)   # (B,)
    return 2.0 * WINDOW * lse - uv


def reference_loss(x, contexts, V_weight, U_weight):
    vc = jnp.take(V_weight, x, axis=0)
    u_context = jnp.take(U_weight, contexts, axis=0)
    uv_context = jnp.einsum('bcn,bn->bc', u_context, vc)
    u_all = vc @ U_weight.T
    lse = jax.scipy.special.logsumexp(u_all, axis=1)
    return 2 * WINDOW * lse - uv_context.sum(axis=1)


if __name__ == "__main__":
    key = jax.random.PRNGKey(0)
    k1, k2, k3, k4, k5, k6 = jax.random.split(key, 6)

    Vocab = 256      # V
    n_dim = 128      # n
    B = 8            # batch
    C = 2 * WINDOW   # context words per center word

    initrange = 0.5 / n_dim
    # PyTorch .normal_(-initrange, initrange): mean=-initrange, std=initrange
    V_weight = (-initrange + initrange *
                jax.random.normal(k1, (Vocab, n_dim))).astype(jnp.float32)
    U_weight = (-initrange + initrange *
                jax.random.normal(k2, (Vocab, n_dim))).astype(jnp.float32)

    x = jax.random.randint(k3, (B,), 0, Vocab, dtype=jnp.int32)
    contexts = jax.random.randint(k4, (B, C), 0, Vocab, dtype=jnp.int32)

    ref = reference_loss(x, contexts, V_weight, U_weight)

    # 1) Single full-extent tile (Vocab <= default tile), f32 table, no split.
    loss = jax.block_until_ready(skipgram_loss(x, contexts, V_weight, U_weight))
    assert loss.shape == (B,)
    assert jnp.allclose(loss, ref, atol=1e-4, rtol=1e-4), (loss, ref)

    # 2) Multi-tile vocab + 2-way split: exercises the online-logsumexp carry
    #    and the per-split partial-LSE combine.
    loss_t = jax.block_until_ready(
        skipgram_loss(x, contexts, V_weight, U_weight, tile_vocab=128))
    assert jnp.allclose(loss_t, ref, atol=1e-4, rtol=1e-4), (loss_t, ref)

    # 3) bf16 table, pre-cast ONCE (persistent) and streamed as-is: halves the
    #    dominant HBM read; f32 accumulation keeps drift small.
    U_bf16 = U_weight.astype(jnp.bfloat16)
    loss_bf16 = jax.block_until_ready(
        skipgram_loss(x, contexts, V_weight, U_bf16, tile_vocab=128))
    assert jnp.allclose(loss_bf16, ref, atol=5e-2, rtol=5e-3), (loss_bf16, ref)

    # 4) Vocab not a multiple of the tile (masked partial trailing tile).
    Vocab2 = 200
    V2, U2 = V_weight[:Vocab2], U_weight[:Vocab2]
    x2, ctx2 = x % Vocab2, contexts % Vocab2
    ref2 = reference_loss(x2, ctx2, V2, U2)
    loss2 = jax.block_until_ready(
        skipgram_loss(x2, ctx2, V2, U2, tile_vocab=128))
    assert jnp.allclose(loss2, ref2, atol=1e-4, rtol=1e-4), (loss2, ref2)

    # 5) Odd tile count (3 tiles, 2 splits): exercises the clamped, fully
    #    masked duplicate tile on the second split.
    Vocab3 = 384
    V3 = (-initrange + initrange *
          jax.random.normal(k5, (Vocab3, n_dim))).astype(jnp.float32)
    U3 = (-initrange + initrange *
          jax.random.normal(k6, (Vocab3, n_dim))).astype(jnp.float32)
    x3, ctx3 = x % Vocab3, contexts % Vocab3
    ref3 = reference_loss(x3, ctx3, V3, U3)
    loss3 = jax.block_until_ready(
        skipgram_loss(x3, ctx3, V3, U3, tile_vocab=128))
    assert jnp.allclose(loss3, ref3, atol=1e-4, rtol=1e-4), (loss3, ref3)

    print("KERNEL_OK")
</pallas_src>

<mosaic_0001>
module attributes {stable_mosaic.version = 11 : i64} {
  func.func @_skipgram_lse_kernel(%arg0: i32, %arg1: i32, %arg2: memref<8x128xf32, #tpu.memory_space<vmem>>, %arg3: memref<256x128xf32, #tpu.memory_space<vmem>>, %arg4: memref<1x8x128xf32, #tpu.memory_space<vmem>>, %arg5: memref<8x1xf32, #tpu.memory_space<vmem>>, %arg6: memref<8x1xf32, #tpu.memory_space<vmem>>) attributes {dimension_semantics = [#tpu.dimension_semantics<parallel>, #tpu.dimension_semantics<arbitrary>], iteration_bounds = array<i64: 1, 1>, scalar_prefetch = 0 : i64, scratch_operands = 2 : i64, tpu.core_type = #tpu.core_type<tc>, window_params = [{pipeline_mode = #tpu.pipeline_mode<synchronous>, transform_indices = @transform_0, window_bounds = array<i64: 8, 128>}, {transform_indices = @transform_1, window_bounds = array<i64: 256, 128>}, {transform_indices = @transform_2, window_bounds = array<i64: 1, 8, 128>}]} {
    %c0_i32 = arith.constant 0 : i32
    %0 = arith.cmpi eq, %arg1, %c0_i32 : i32
    %1 = arith.extui %0 : i1 to i32
    %c0_i32_0 = arith.constant 0 : i32
    %2 = arith.cmpi ne, %1, %c0_i32_0 : i32
    scf.if %2 {
      %cst_16 = arith.constant 0xFF800000 : f32
      %25 = vector.broadcast %cst_16 : f32 to vector<8x1xf32>
      %c0_17 = arith.constant 0 : index
      %c0_18 = arith.constant 0 : index
      %26 = vector.load %arg5[%c0_17, %c0_18] : memref<8x1xf32, #tpu.memory_space<vmem>>, vector<8x1xf32>
      tpu.vector_store %arg5[%c0_17, %c0_18], %25 {strides = array<i32>} : memref<8x1xf32, #tpu.memory_space<vmem>>, vector<8x1xf32>,
      %cst_19 = arith.constant 0.000000e+00 : f32
      %27 = vector.broadcast %cst_19 : f32 to vector<8x1xf32>
      %c0_20 = arith.constant 0 : index
      %c0_21 = arith.constant 0 : index
      %28 = vector.load %arg6[%c0_20, %c0_21] : memref<8x1xf32, #tpu.memory_space<vmem>>, vector<8x1xf32>
      tpu.vector_store %arg6[%c0_20, %c0_21], %27 {strides = array<i32>} : memref<8x1xf32, #tpu.memory_space<vmem>>, vector<8x1xf32>,
    } else {
    }
    %c0 = arith.constant 0 : index
    %c0_1 = arith.constant 0 : index
    %3 = vector.load %arg2[%c0, %c0_1] : memref<8x128xf32, #tpu.memory_space<vmem>>, vector<8x128xf32>
    %c0_2 = arith.constant 0 : index
    %c0_3 = arith.constant 0 : index
    %4 = vector.load %arg3[%c0_2, %c0_3] : memref<256x128xf32, #tpu.memory_space<vmem>>, vector<256x128xf32>
    %cst = arith.constant dense<0.000000e+00> : vector<8x256xf32>
    %5 = tpu.matmul %3, %4, %cst {dimension_numbers = #tpu.dot_dimension_numbers<[1], [1], [0], [0], [0, 0, 1, 0], [], []>} : vector<8x128xf32>, vector<256x128xf32>, vector<8x256xf32> -> vector<8x256xf32>
    %c0_4 = arith.constant 0 : index
    %c0_5 = arith.constant 0 : index
    %6 = vector.load %arg5[%c0_4, %c0_5] : memref<8x1xf32, #tpu.memory_space<vmem>>, vector<8x1xf32>
    %cst_6 = arith.constant dense<0xFF800000> : vector<8xf32>
    %7 = vector.multi_reduction <maximumf>, %5, %cst_6 [1] : vector<8x256xf32> to vector<8xf32>
    %8 = vector.shape_cast %7 : vector<8xf32> to vector<8x1xf32>
    %9 = arith.maximumf %6, %8 : vector<8x1xf32>
    %10 = arith.subf %6, %9 : vector<8x1xf32>
    %11 = math.exp %10 : vector<8x1xf32>
    %c0_7 = arith.constant 0 : index
    %c0_8 = arith.constant 0 : index
    %12 = vector.load %arg6[%c0_7, %c0_8] : memref<8x1xf32, #tpu.memory_space<vmem>>, vector<8x1xf32>
    %13 = arith.mulf %11, %12 : vector<8x1xf32>
    %14 = vector.broadcast %9 : vector<8x1xf32> to vector<8x256xf32>
    %15 = arith.subf %5, %14 : vector<8x256xf32>
    %16 = math.exp %15 : vector<8x256xf32>
    %cst_9 = arith.constant dense<0.000000e+00> : vector<8xf32>
    %17 = vector.multi_reduction <add>, %16, %cst_9 [1] : vector<8x256xf32> to vector<8xf32>
    %18 = vector.shape_cast %17 : vector<8xf32> to vector<8x1xf32>
    %19 = arith.addf %13, %18 : vector<8x1xf32>
    %c0_10 = arith.constant 0 : index
    %c0_11 = arith.constant 0 : index
    %20 = vector.load %arg6[%c0_10, %c0_11] : memref<8x1xf32, #tpu.memory_space<vmem>>, vector<8x1xf32>
    tpu.vector_store %arg6[%c0_10, %c0_11], %19 {strides = array<i32>} : memref<8x1xf32, #tpu.memory_space<vmem>>, vector<8x1xf32>,
    %c0_12 = arith.constant 0 : index
    %c0_13 = arith.constant 0 : index
    %21 = vector.load %arg5[%c0_12, %c0_13] : memref<8x1xf32, #tpu.memory_space<vmem>>, vector<8x1xf32>
    tpu.vector_store %arg5[%c0_12, %c0_13], %9 {strides = array<i32>} : memref<8x1xf32, #tpu.memory_space<vmem>>, vector<8x1xf32>,
    %c0_i32_14 = arith.constant 0 : i32
    %22 = arith.cmpi eq, %arg1, %c0_i32_14 : i32
    %23 = arith.extui %22 : i1 to i32
    %c0_i32_15 = arith.constant 0 : i32
    %24 = arith.cmpi ne, %23, %c0_i32_15 : i32
    scf.if %24 {
      %c0_16 = arith.constant 0 : index
      %c0_17 = arith.constant 0 : index
      %25 = vector.load %arg5[%c0_16, %c0_17] : memref<8x1xf32, #tpu.memory_space<vmem>>, vector<8x1xf32>
      %c0_18 = arith.constant 0 : index
      %c0_19 = arith.constant 0 : index
      %26 = vector.load %arg6[%c0_18, %c0_19] : memref<8x1xf32, #tpu.memory_space<vmem>>, vector<8x1xf32>
      %27 = math.log %26 : vector<8x1xf32>
      %28 = arith.addf %25, %27 : vector<8x1xf32>
      %29 = vector.shape_cast %28 : vector<8x1xf32> to vector<1x8x1xf32>
      %30 = vector.shape_cast %29 : vector<1x8x1xf32> to vector<1x8x1xf32>
      %31 = vector.broadcast %30 : vector<1x8x1xf32> to vector<1x8x128xf32>
      %c0_20 = arith.constant 0 : index
      %c0_21 = arith.constant 0 : index
      %c0_22 = arith.constant 0 : index
      %32 = vector.load %arg4[%c0_20, %c0_21, %c0_22] : memref<1x8x128xf32, #tpu.memory_space<vmem>>, vector<1x8x128xf32>
      tpu.vector_store %arg4[%c0_20, %c0_21, %c0_22], %31 {strides = array<i32>} : memref<1x8x128xf32, #tpu.memory_space<vmem>>, vector<1x8x128xf32>,
    } else {
    }
    return
  }
  func.func @transform_0(%arg0: i32, %arg1: i32) -> (i32, i32) {
    %c0_i32 = arith.constant 0 : i32
    %c0_i32_0 = arith.constant 0 : i32
    %c0_i32_1 = arith.constant 0 : i32
    return %c0_i32, %c0_i32_0 : i32, i32
  }
  func.func @transform_1(%arg0: i32, %arg1: i32) -> (i32, i32) {
    %c1_i32 = arith.constant 1 : i32
    %0 = arith.muli %arg0, %c1_i32 : i32
    %1 = arith.addi %0, %arg1 : i32
    %c0_i32 = arith.constant 0 : i32
    %c0_i32_0 = arith.constant 0 : i32
    return %1, %c0_i32 : i32, i32
  }
  func.func @transform_2(%arg0: i32, %arg1: i32) -> (i32, i32, i32) {
    %c0_i32 = arith.constant 0 : i32
    %c0_i32_0 = arith.constant 0 : i32
    %c0_i32_1 = arith.constant 0 : i32
    return %arg0, %c0_i32, %c0_i32_0 : i32, i32, i32
  }
}

</mosaic_0001>

<bundles_post_ra>
// kernel: tpu_custom_call.1
= control target key start
LH: loop header
LB: loop body
LE: loop exit
PB: predicated region body
PF: predicated region fallthrough
CT: control target
= control target key end

     0   :  { %7 = vsyncpa [#allocation5], 0  ;;  %s439_s0 = inlined_call_operand.hbm [shape: f32[8,128], index: 0, kind: input, shape index: {}]   ;;  %s440_s1 = inlined_call_operand.hbm [shape: f32[256,128], index: 1, kind: input, shape index: {}]   ;;  %s441_s2 = inlined_call_operand.hbm [shape: f32[1,8,128], index: 2, kind: output, shape index: {}]  }
   0x1   :  { %8 = vsyncpa [#allocation8], 0 }
   0x2   :  { %9 = vsyncpa [#allocation6], 0  ;;  %s369_s9 = smov [#allocation4]   ;;  %s370_s11 = smov [#allocation7]  }
   0x3   :  { %s16_s10 = sshll.u32 %s369_s9, 4  ;;  %s29_s12 = sshll.u32 %s370_s11, 4  ;;  %s17_s10 = int_to_ptr.vmem [resolvable:$true] %s16_s10  ;;  %s392_s12 = int_to_ptr.vmem [resolvable:$true] %s29_s12 }
   0x4   :  { %s297_s15 = scalar_lea.hbm %s439_s0, 128 }
   0x5   :  { %p298_p0 = scmp.ne.s32.totalorder %s439_s0, %s297_s15  ;;  %p301_p1 = scmp.lt.u32.totalorder %s297_s15, %s439_s0 }
   0x7   :  { %p303_p2 = pnand %p301_p1, %p298_p0 }
   0x9   :  { %306 = shalt.err (!%p303_p2)
}
   0xa   :  { %s307_s20 = scalar_lea.vmem %s17_s10, 128  ;;  %p312_p4 = scmp.lt.s32.totalorder %s17_s10, %s17_s10 }
   0xb   :  { %p308_p3 = scmp.ne.s32.totalorder %s17_s10, %s307_s20  ;;  %p313_p5 = scmp.lt.s32.totalorder %s307_s20, %s307_s20 }
   0xd   :  { %p314_p6 = por %p313_p5, %p312_p4 }
   0xf   :  { %p315_p7 = pnand %p314_p6, %p308_p3 }
  0x11   :  { %318 = shalt.err (!%p315_p7)
}
  0x12   :  { %19 = dma.hbm_to_vmem [thread:$0]  %s439_s0, 128, %s17_s10, [#allocation5]  }
  0x13   :  { %s319_s25 = scalar_lea.hbm %s440_s1, 4096 }
  0x14   :  { %p320_p8 = scmp.ne.s32.totalorder %s440_s1, %s319_s25  ;;  %p323_p9 = scmp.lt.u32.totalorder %s319_s25, %s440_s1 }
  0x16   :  { %p325_p10 = pnand %p323_p9, %p320_p8 }
  0x18   :  { %328 = shalt.err (!%p325_p10)
}
  0x19   :  { %s329_s30 = scalar_lea.vmem %s392_s12, 4096  ;;  %p334_p12 = scmp.lt.s32.totalorder %s392_s12, %s392_s12 }
  0x1a   :  { %p330_p11 = scmp.ne.s32.totalorder %s392_s12, %s329_s30  ;;  %p335_p13 = scmp.lt.s32.totalorder %s329_s30, %s329_s30 }
  0x1c   :  { %p336_p0 = por %p335_p13, %p334_p12 }
  0x1e   :  { %p337_p1 = pnand %p336_p0, %p330_p11 }
  0x20   :  { %340 = shalt.err (!%p337_p1)
}
  0x21   :  { %s371_s0 = smov 128   ;;  %s372_s3 = smov 8  }
  0x22   :  { %35 = dma.hbm_to_vmem [thread:$0]  %s440_s1, 4096, %s392_s12, [#allocation8], %s371_s0, %s371_s0, %s372_s3  }
  0x23   :  { %363 = dma.done.wait [#allocation5], 128  }
  0x24   :  { %364 = vsyncadd [#allocation5], 4294967168 }
  0x25   :  { %365 = dma.done.wait [#allocation8], 4096  }
  0x26   :  { %366 = vsyncadd [#allocation8], 4294963200  ;;  %v68_v0 = vld [vmem:[#allocation7 + $0x80] sm:$0xff]  ;;  %v69_v1 = vld [vmem:[#allocation7 + $0x88] sm:$0xff]  ;;  %vm48_vm0 = vcmask 7168   ;;  %v373_v49 = vmov -inf  }
  0x27   :  { %v52_v2 = vld [vmem:[#allocation7] sm:$0xff]  ;;  %v247_v3 = vpack.c.bf16 %v69_v1, %v68_v0  ;;  %v53_v4 = vld [vmem:[#allocation7 + $0x8] sm:$0xff]  ;;  %v70_v5 = vld [vmem:[#allocation7 + $0x90] sm:$0xff]  ;;  %49 = vst.msk [vmem:[#allocation2] sm:$0xff] %vm48_vm0, %v373_v49  ;;  %v374_v53 = vmov 0   ;;  %v375_v54 = vmov 0.0  }
  0x28   :  { %v71_v6 = vld [vmem:[#allocation7 + $0x98] sm:$0xff]  ;;  %v249_v7 = vpack.c.bf16 %v53_v4, %v52_v2  ;;  %v54_v9 = vld [vmem:[#allocation7 + $0x10] sm:$0xff]  ;;  %v72_v11 = vld [vmem:[#allocation7 + $0xa0] sm:$0xff]  ;;  %287 = vset.pattern.permute.xlu0 %v374_v53  ;;  %288 = vset.pattern.permute.xlu1 %v374_v53  ;;  %50 = vst.msk [vmem:[#allocation3] sm:$0xff] %vm48_vm0, %v375_v54  ;;  %s376_s1 = smov [#allocation9]  }
  0x29   :  { %v251_v8 = vpack.c.bf16 %v71_v6, %v70_v5  ;;  %248 = vmatprep.subr.bf16.mxu0 %v247_v3  ;;  %v55_v10 = vld [vmem:[#allocation7 + $0x18] sm:$0xff]  ;;  %v73_v12 = vld [vmem:[#allocation7 + $0xa8] sm:$0xff]  ;;  %v56_v16 = vld [vmem:[#allocation7 + $0x20] sm:$0xff]  ;;  %s203_s6 = sshll.u32 %s376_s1, 4  ;;  %s204_s6 = int_to_ptr.vmem [resolvable:$true] %s203_s6 }
  0x2a   :  { %250 = vmatpush3.bf16.xpose.msra.mxu0 %v249_v7  ;;  %v253_v13 = vpack.c.bf16 %v55_v10, %v54_v9  ;;  %v255_v14 = vpack.c.bf16 %v73_v12, %v72_v11  ;;  %v51_v15 = vld [vmem:[#allocation4] sm:$0xff]  ;;  %v57_v17 = vld [vmem:[#allocation7 + $0x28] sm:$0xff]  ;;  %v74_v18 = vld [vmem:[#allocation7 + $0xb0] sm:$0xff]  ;;  %s341_s7 = scalar_lea.vmem %s204_s6, 128  ;;  %p346_p3 = scmp.lt.s32.totalorder %s204_s6, %s204_s6 }
  0x2b   :  { %252 = vmatprep.subr.bf16.mxu0 %v251_v8  ;;  %245 = vmatprep.mubr.f32.mxu0 %v51_v15  ;;  %v75_v19 = vld [vmem:[#allocation7 + $0xb8] sm:$0xff]  ;;  %v257_v20 = vpack.c.bf16 %v57_v17, %v56_v16  ;;  %v58_v22 = vld [vmem:[#allocation7 + $0x30] sm:$0xff]  ;;  %v76_v24 = vld [vmem:[#allocation7 + $0xc0] sm:$0xff]  ;;  %p342_p2 = scmp.ne.s32.totalorder %s204_s6, %s341_s7  ;;  %p347_p4 = scmp.lt.s32.totalorder %s341_s7, %s341_s7 }
  0x2c   :  { %v259_v21 = vpack.c.bf16 %v75_v19, %v74_v18  ;;  %v59_v23 = vld [vmem:[#allocation7 + $0x38] sm:$0xff]  ;;  %v77_v25 = vld [vmem:[#allocation7 + $0xc8] sm:$0xff]  ;;  %v60_v28 = vld [vmem:[#allocation7 + $0x40] sm:$0xff] }
  0x2d   :  { %v261_v26 = vpack.c.bf16 %v59_v23, %v58_v22  ;;  %v263_v27 = vpack.c.bf16 %v77_v25, %v76_v24  ;;  %v61_v29 = vld [vmem:[#allocation7 + $0x48] sm:$0xff]  ;;  %v78_v30 = vld [vmem:[#allocation7 + $0xd0] sm:$0xff]  ;;  %v79_v31 = vld [vmem:[#allocation7 + $0xd8] sm:$0xff]  ;;  %p348_p5 = por %p347_p4, %p346_p3 }
  0x2e   :  { %v265_v32 = vpack.c.bf16 %v61_v29, %v60_v28  ;;  %v267_v33 = vpack.c.bf16 %v79_v31, %v78_v30  ;;  %v62_v34 = vld [vmem:[#allocation7 + $0x50] sm:$0xff]  ;;  %v63_v35 = vld [vmem:[#allocation7 + $0x58] sm:$0xff]  ;;  %v80_v36 = vld [vmem:[#allocation7 + $0xe0] sm:$0xff] }
  0x2f   :  { %v81_v37 = vld [vmem:[#allocation7 + $0xe8] sm:$0xff]  ;;  %v269_v38 = vpack.c.bf16 %v63_v35, %v62_v34  ;;  %v64_v40 = vld [vmem:[#allocation7 + $0x60] sm:$0xff]  ;;  %v82_v42 = vld [vmem:[#allocation7 + $0xf0] sm:$0xff]  ;;  %p349_p6 = pnand %p348_p5, %p342_p2 }
  0x30   :  { %v271_v39 = vpack.c.bf16 %v81_v37, %v80_v36  ;;  %v65_v41 = vld [vmem:[#allocation7 + $0x68] sm:$0xff]  ;;  %v83_v43 = vld [vmem:[#allocation7 + $0xf8] sm:$0xff]  ;;  %v66_v46 = vld [vmem:[#allocation7 + $0x70] sm:$0xff] }
  0x31   :  { %v273_v44 = vpack.c.bf16 %v65_v41, %v64_v40  ;;  %v275_v45 = vpack.c.bf16 %v83_v43, %v82_v42  ;;  %v67_v47 = vld [vmem:[#allocation7 + $0x78] sm:$0xff]  ;;  %v155_v55 = vld [vmem:[#allocation2] sm:$0xff]  ;;  %v163_v5 = vld [vmem:[#allocation3] sm:$0xff] }
  0x32   :  { %254 = vmatpush3.bf16.xpose.msra.mxu0 %v253_v13  ;;  %v277_v48 = vpack.c.bf16 %v67_v47, %v66_v46 }
  0x33   :  { %256 = vmatprep.subr.bf16.mxu0 %v255_v14 }
  0x3a   :  { %258 = vmatpush3.bf16.xpose.msra.mxu0 %v257_v20 }
  0x3b   :  { %260 = vmatprep.subr.bf16.mxu0 %v259_v21 }
  0x42   :  { %262 = vmatpush3.bf16.xpose.msra.mxu0 %v261_v26 }
  0x43   :  { %264 = vmatprep.subr.bf16.mxu0 %v263_v27 }
  0x4a   :  { %266 = vmatpush3.bf16.xpose.msra.mxu0 %v265_v32 }
  0x4b   :  { %268 = vmatprep.subr.bf16.mxu0 %v267_v33 }
  0x52   :  { %270 = vmatpush3.bf16.xpose.msra.mxu0 %v269_v38 }
  0x53   :  { %272 = vmatprep.subr.bf16.mxu0 %v271_v39 }
  0x5a   :  { %274 = vmatpush3.bf16.xpose.msra.mxu0 %v273_v44 }
  0x5b   :  { %276 = vmatprep.subr.bf16.mxu0 %v275_v45 }
  0x62   :  { %278 = vmatpush3.bf16.xpose.msra.mxu0 %v277_v48 }
  0x69   :  { %246 = vmatmul.mubr.f32.vlgmr.msra.gmra.mrb[0].mxu0 %v51_v15 }
 0x13c   :  { %v150_v50 = vpop.f32.mrb[0].mxu0 }
 0x13d   :  { %v152_v51 = vpop.f32.mrb[1].mxu0 }
 0x13e   :  { %v156_v52 = vmax.f32 %v150_v50, %v152_v51 }
 0x140   :  { %157 = vmax.xlane.f32.xlu0 %v156_v52 }
 0x1cd   :  { %v158_v56 = vpop.xlane.xlu0 %157 }
 0x1ce   :  { %v159_v57 = vmax.f32 %v155_v55, %v158_v56 }
 0x1d0   :  { %v160_v58 = vsub.f32 %v155_v55, %v159_v57  ;;  %182 = vst.msk [vmem:[#allocation2] sm:$0xff] %vm48_vm0, %v159_v57  ;;  %167 = vperm.xlu0 %287, %v159_v57  }
 0x1d2   :  { %v161_v3 = vmul.f32 1.442695, %v160_v58 }
 0x1d7   :  { %v186_v12 = vld [vmem:[#allocation2] sm:$0xff] }
 0x24f   :  { %v168_v59 = vpop.permute.xlu0 %167 }
 0x250   :  { %v170_v60 = vsub.f32 %v150_v50, %v168_v59  ;;  %v171_v61 = vsub.f32 %v152_v51, %v168_v59 }
 0x252   :  { %v172_v62 = vmul.f32 1.442695, %v170_v60  ;;  %v174_v63 = vmul.f32 1.442695, %v171_v61 }
 0x254   :  { %289 = vpow2.f32 %v172_v62 }
 0x255   :  { %291 = vpow2.f32 %v174_v63 }
 0x256   :  { %293 = vpow2.f32 %v161_v3 }
 0x25e   :  { %v290_v0 = vpop.eup %289 }
 0x25f   :  { %v292_v1 = vpop.eup %291 }
 0x260   :  { %v176_v2 = vadd.f32 %v292_v1, %v290_v0  ;;  %v294_v4 = vpop.eup %293 }
 0x261   :  { %v164_v6 = vmul.f32 %v294_v4, %v163_v5 }
 0x262   :  { %177 = vadd.xlane.f32.xlu1 %v176_v2 }
 0x2ef   :  { %v178_v7 = vpop.xlane.xlu1 %177 }
 0x2f0   :  { %v179_v8 = vadd.f32 %v178_v7, %v164_v6 }
 0x2f2   :  { %181 = vst.msk [vmem:[#allocation3] sm:$0xff] %vm48_vm0, %v179_v8 }
 0x2f9   :  { %v187_v9 = vld [vmem:[#allocation3] sm:$0xff] }
 0x2fa   :  { %295 = vlog2.f32 %v187_v9 }
 0x304   :  { %v296_v10 = vpop.eup %295 }
 0x305   :  { %v189_v11 = vmul.f32 0.6931472, %v296_v10 }
 0x307   :  { %v190_v13 = vadd.f32 %v189_v11, %v186_v12 }
 0x309   :  { %193 = vperm.xlu1 %288, %v190_v13  }
 0x388   :  { %v194_v14 = vpop.permute.xlu1 %193 }
 0x389   :  { %196 = vst [vmem:[#allocation9] sm:$0xff] %v194_v14 }
 0x38a   :  { %352 = shalt.err (!%p349_p6)
}
 0x38b   :  { %s353_s10 = scalar_lea.hbm %s441_s2, 128 }
 0x38c   :  { %p354_p7 = scmp.ne.s32.totalorder %s441_s2, %s353_s10  ;;  %p357_p8 = scmp.lt.u32.totalorder %s353_s10, %s441_s2 }
 0x38e   :  { %p359_p9 = pnand %p357_p8, %p354_p7 }
 0x390   :  { %362 = shalt.err (!%p359_p9)
}
 0x391   :  { %206 = dma.vmem_to_hbm [thread:$0]  %s204_s6, 128, %s441_s2, [#allocation6]  }
 0x392   :  { %367 = dma.done.wait [#allocation6], 128  }
 0x393   :  { %368 = vsyncadd [#allocation6], 4294967168 }
 0x394   :  { %210 = vsyncpa [#allocation5], 1 }
 0x395   :  { %211 = vsyncpa [#allocation8], 1 }
 0x396   :  { %212 = vsyncpa [#allocation6], 1 }

</bundles_post_ra>
